<compile_context>
chip_gen: v7x
topology: tpu7x:2x2x1
jax: 0.10.0
libtpu: 0.0.40
codegen_flags: <defaults>
</compile_context>

<pallas_src>
import math
import functools

import jax
import jax.numpy as jnp
from jax.experimental import pallas as pl
from jax.experimental.pallas import tpu as pltpu


# ----------------------------------------------------------------------------- kernel

def _transform_kernel(x_ref, w_ref, b_ref, g_ref, beta_ref, o_ref, *, eps, approx_gelu):
    # x_ref:    (rm, H)   tile of flattened hidden_states
    # w_ref:    (H, H)    dense weight, already transposed to [in, out] (grid-invariant)
    # b_ref:    (1, H)    dense bias
    # g_ref:    (1, H)    LayerNorm weight (gamma)
    # beta_ref: (1, H)    LayerNorm bias (beta)
    x = x_ref[...]
    w = w_ref[...]
    if x.dtype != w.dtype:           # wrapper normally guarantees equal dtypes
        x = x.astype(w.dtype)

    # Native [M,K] x [K,N] matmul on the MXU, f32 accumulation.
    h = jnp.dot(x, w, preferred_element_type=jnp.float32)
    h = h + b_ref[...].astype(jnp.float32)

    if approx_gelu:
        # tanh-gelu: transcendental goes to the (otherwise idle) EUP slot.
        c = math.sqrt(2.0 / math.pi)
        h = 0.5 * h * (1.0 + jnp.tanh(c * (h + 0.044715 * h * h * h)))
    else:
        # Exact erf-gelu, as in the original BERT repo.
        h = h * 0.5 * (1.0 + jax.lax.erf(h * (1.0 / math.sqrt(2.0))))

    # LayerNorm over the hidden axis (biased variance, like torch.nn.LayerNorm).
    mu = jnp.mean(h, axis=-1, keepdims=True)
    d = h - mu
    var = jnp.mean(d * d, axis=-1, keepdims=True)
    h = d * jax.lax.rsqrt(var + eps)
    h = h * g_ref[...].astype(jnp.float32) + beta_ref[...].astype(jnp.float32)

    o_ref[...] = h.astype(o_ref.dtype)


# ----------------------------------------------------------------------------- helpers

def _round_up(x, m):
    return (x + m - 1) // m * m


def _vmem_limit_bytes():
    """Generation-aware scoped-VMEM limit: ~3/4 of physical, capped at 96 MiB.
    v5e/v6e (128 MiB) -> 96 MiB; v7x (64 MiB/TC) -> 48 MiB."""
    cap = 64 << 20  # conservative fallback = v7x per-TC capacity
    try:
        info = pltpu.get_tpu_info()
        cap = int(getattr(info, "vmem_capacity_bytes", cap))
    except Exception:
        pass
    return int(min(cap * 3 // 4, 96 << 20))


def _pick_row_tile(R, H, x_dtype, w_dtype, out_dtype, vmem_limit_bytes,
                   max_tile=1024, min_grid_steps=2):
    """Largest 8-multiple row tile whose pipelined footprint fits the same VMEM
    budget we hand to the compiler (minus headroom), balanced so the last tile
    isn't mostly padding and the grid has >= min_grid_steps steps when possible."""
    in_b = jnp.dtype(x_dtype).itemsize
    out_b = jnp.dtype(out_dtype).itemsize
    w_b = jnp.dtype(w_dtype).itemsize

    budget = max(vmem_limit_bytes - (4 << 20), 2 << 20)      # ~4 MiB headroom
    resident = H * H * w_b + 3 * _round_up(H, 128) * 4       # single-buffered W + b/gamma/beta
    avail = max(budget - resident, 1 << 20)
    # double-buffered x tile + double-buffered out tile + ~3 live f32 temps (h, d, gelu)
    per_row = H * (2 * in_b + 2 * out_b + 3 * 4)

    tile = min(max_tile, avail // per_row)
    tile = max(8, (int(tile) // 8) * 8)

    Rp8 = _round_up(max(R, 1), 8)
    tile = min(tile, Rp8)

    # Balance into the minimum number of even steps, with >=2 steps when the
    # row count allows it (keeps both v7x TensorCores busy via the parallel axis).
    n_steps = pl.cdiv(Rp8, tile)
    n_steps = max(n_steps, min(min_grid_steps, Rp8 // 8))
    tile = _round_up(pl.cdiv(Rp8, n_steps), 8)
    return int(tile)


def _const_spec(shape):
    """BlockSpec for a grid-invariant operand; single-buffered when supported."""
    index_map = lambda i: (0,) * len(shape)
    try:
        return pl.BlockSpec(shape, index_map, pipeline_mode=pl.Buffered(1))
    except TypeError:  # older jax without pipeline_mode / Buffered
        return pl.BlockSpec(shape, index_map)


# ----------------------------------------------------------------------------- wrapper

def bert_prediction_head_transform(hidden_states, dense_w, dense_b, ln_w, ln_b,
                                   *, eps=1e-12, row_tile=None, approx_gelu=False):
    """hidden_states: [..., H]; dense_w: [H, H] in PyTorch (out x in) layout."""
    orig_shape = hidden_states.shape
    H = orig_shape[-1]
    x2d = hidden_states.reshape(-1, H)
    R = x2d.shape[0]

    # Hoist the transpose: one XLA transpose in HBM -> contiguous [in, out]
    # weight, so the kernel's matmul is a plain [M,K] x [K,N] contraction.
    # Also pin the MXU dtype to the activation dtype (avoid silent f32 promotion
    # when activations are bf16 and the weight is f32 -- the v5e killer).
    w_t = jnp.transpose(dense_w)
    if w_t.dtype != x2d.dtype:
        w_t = w_t.astype(x2d.dtype)

    vmem_limit = _vmem_limit_bytes()
    if row_tile is None:
        row_tile = _pick_row_tile(R, H, x2d.dtype, w_t.dtype, x2d.dtype, vmem_limit)
    row_tile = max(8, _round_up(int(row_tile), 8))

    # Pad rows to a tile multiple (padded rows do throwaway work, sliced off after).
    Rp = _round_up(R, row_tile)
    if Rp != R:
        x2d = jnp.pad(x2d, ((0, Rp - R), (0, 0)))

    b2d = dense_b.reshape(1, H)
    g2d = ln_w.reshape(1, H)
    beta2d = ln_b.reshape(1, H)

    itemsize = jnp.dtype(x2d.dtype).itemsize
    cost = pl.CostEstimate(
        flops=2 * Rp * H * H,
        transcendentals=Rp * H,
        bytes_accessed=(2 * Rp * H * itemsize                       # x in + out
                        + H * H * jnp.dtype(w_t.dtype).itemsize     # weight
                        + 3 * H * 4),                               # bias/gamma/beta
    )

    out = pl.pallas_call(
        functools.partial(_transform_kernel, eps=eps, approx_gelu=approx_gelu),
        out_shape=jax.ShapeDtypeStruct((Rp, H), hidden_states.dtype),
        grid_spec=pltpu.PrefetchScalarGridSpec(
            num_scalar_prefetch=0,
            grid=(Rp // row_tile,),
            in_specs=[
                pl.BlockSpec((row_tile, H), lambda i: (i, 0)),   # x tile (double-buffered)
                _const_spec((H, H)),                             # W [in, out], resident
                _const_spec((1, H)),                             # dense bias
                _const_spec((1, H)),                             # LN gamma
                _const_spec((1, H)),                             # LN beta
            ],
            out_specs=pl.BlockSpec((row_tile, H), lambda i: (i, 0)),
        ),
        compiler_params=pltpu.CompilerParams(
            dimension_semantics=("parallel",),
            vmem_limit_bytes=vmem_limit,
        ),
        cost_estimate=cost,
    )(x2d, w_t, b2d, g2d, beta2d)

    if Rp != R:
        out = out[:R]
    return out.reshape(orig_shape)

# TODO(synk): for very large hidden sizes (H >= 2048, f32) the fully resident
# weight no longer fits v7x's 64 MiB/TC VMEM; that case needs a second grid axis
# tiling W's output dimension with a LayerNorm finalize step.


# ----------------------------------------------------------------------------- demo

if __name__ == "__main__":
    B, S, H = 2, 8, 32   # small demo shapes; real BERT would use H=768/1024

    key = jax.random.PRNGKey(0)
    kx, kw, kb, kg, kbeta = jax.random.split(key, 5)

    x = jax.random.normal(kx, (B, S, H), dtype=jnp.float32)
    dense_w = jax.random.normal(kw, (H, H), dtype=jnp.float32) * 0.02   # [out, in]
    dense_b = jax.random.normal(kb, (H,), dtype=jnp.float32) * 0.02
    ln_w = jnp.ones((H,), dtype=jnp.float32) + 0.1 * jax.random.normal(kg, (H,), dtype=jnp.float32)
    ln_b = 0.1 * jax.random.normal(kbeta, (H,), dtype=jnp.float32)

    def ref_fn(xx):
        h = xx @ dense_w.T + dense_b
        h = h * 0.5 * (1.0 + jax.lax.erf(h / math.sqrt(2.0)))
        mu = jnp.mean(h, axis=-1, keepdims=True)
        var = jnp.mean(jnp.square(h - mu), axis=-1, keepdims=True)
        return (h - mu) / jnp.sqrt(var + 1e-12) * ln_w + ln_b

    out = bert_prediction_head_transform(x, dense_w, dense_b, ln_w, ln_b)
    jax.block_until_ready(out)
    assert out.shape == x.shape
    assert jnp.allclose(out, ref_fn(x), atol=1e-5, rtol=1e-5), "mismatch vs reference"

    # Also exercise the row-padding path (rows not a multiple of the tile).
    x_odd = x[:, :5, :]                                   # R = 10 rows
    out_odd = bert_prediction_head_transform(x_odd, dense_w, dense_b, ln_w, ln_b,
                                             row_tile=16)
    jax.block_until_ready(out_odd)
    assert jnp.allclose(out_odd, ref_fn(x_odd), atol=1e-5, rtol=1e-5), \
        "mismatch vs reference (padded path)"

    print("KERNEL_OK")
</pallas_src>

<mosaic_0001>
module attributes {stable_mosaic.version = 11 : i64} {
  func.func @_transform_kernel(%arg0: i32, %arg1: memref<8x32xf32, #tpu.memory_space<vmem>>, %arg2: memref<32x32xf32, #tpu.memory_space<vmem>>, %arg3: memref<1x32xf32, #tpu.memory_space<vmem>>, %arg4: memref<1x32xf32, #tpu.memory_space<vmem>>, %arg5: memref<1x32xf32, #tpu.memory_space<vmem>>, %arg6: memref<8x32xf32, #tpu.memory_space<vmem>>) attributes {dimension_semantics = [#tpu.dimension_semantics<parallel>], iteration_bounds = array<i64: 2>, scalar_prefetch = 0 : i64, scratch_operands = 0 : i64, tpu.core_type = #tpu.core_type<tc>, window_params = [{transform_indices = @transform_0, window_bounds = array<i64: 8, 32>}, {pipeline_mode = #tpu.pipeline_mode<synchronous>, transform_indices = @transform_1, window_bounds = array<i64: 32, 32>}, {pipeline_mode = #tpu.pipeline_mode<synchronous>, transform_indices = @transform_2, window_bounds = array<i64: 1, 32>}, {pipeline_mode = #tpu.pipeline_mode<synchronous>, transform_indices = @transform_3, window_bounds = array<i64: 1, 32>}, {pipeline_mode = #tpu.pipeline_mode<synchronous>, transform_indices = @transform_4, window_bounds = array<i64: 1, 32>}, {transform_indices = @transform_5, window_bounds = array<i64: 8, 32>}]} {
    %c0 = arith.constant 0 : index
    %c0_0 = arith.constant 0 : index
    %0 = vector.load %arg1[%c0, %c0_0] : memref<8x32xf32, #tpu.memory_space<vmem>>, vector<8x32xf32>
    %c0_1 = arith.constant 0 : index
    %c0_2 = arith.constant 0 : index
    %1 = vector.load %arg2[%c0_1, %c0_2] : memref<32x32xf32, #tpu.memory_space<vmem>>, vector<32x32xf32>
    %cst = arith.constant dense<0.000000e+00> : vector<8x32xf32>
    %2 = tpu.matmul %0, %1, %cst {dimension_numbers = #tpu.dot_dimension_numbers<[1], [0], [0], [1], [0, 0, 1, 1], [], []>} : vector<8x32xf32>, vector<32x32xf32>, vector<8x32xf32> -> vector<8x32xf32>
    %c0_3 = arith.constant 0 : index
    %c0_4 = arith.constant 0 : index
    %3 = vector.load %arg3[%c0_3, %c0_4] : memref<1x32xf32, #tpu.memory_space<vmem>>, vector<1x32xf32>
    %4 = vector.broadcast %3 : vector<1x32xf32> to vector<8x32xf32>
    %5 = arith.addf %2, %4 : vector<8x32xf32>
    %cst_5 = arith.constant 5.000000e-01 : f32
    %6 = vector.broadcast %cst_5 : f32 to vector<8x32xf32>
    %7 = arith.mulf %5, %6 : vector<8x32xf32>
    %cst_6 = arith.constant 0.707106769 : f32
    %8 = vector.broadcast %cst_6 : f32 to vector<8x32xf32>
    %9 = arith.mulf %5, %8 : vector<8x32xf32>
    %10 = math.erf %9 : vector<8x32xf32>
    %cst_7 = arith.constant 1.000000e+00 : f32
    %11 = vector.broadcast %cst_7 : f32 to vector<8x32xf32>
    %12 = arith.addf %11, %10 : vector<8x32xf32>
    %13 = arith.mulf %7, %12 : vector<8x32xf32>
    %cst_8 = arith.constant dense<0.000000e+00> : vector<8xf32>
    %14 = vector.multi_reduction <add>, %13, %cst_8 [1] : vector<8x32xf32> to vector<8xf32>
    %15 = vector.shape_cast %14 : vector<8xf32> to vector<8x1xf32>
    %cst_9 = arith.constant 3.200000e+01 : f32
    %16 = vector.broadcast %cst_9 : f32 to vector<8x1xf32>
    %17 = arith.divf %15, %16 : vector<8x1xf32>
    %18 = vector.broadcast %17 : vector<8x1xf32> to vector<8x32xf32>
    %19 = arith.subf %13, %18 : vector<8x32xf32>
    %20 = arith.mulf %19, %19 : vector<8x32xf32>
    %cst_10 = arith.constant dense<0.000000e+00> : vector<8xf32>
    %21 = vector.multi_reduction <add>, %20, %cst_10 [1] : vector<8x32xf32> to vector<8xf32>
    %22 = vector.shape_cast %21 : vector<8xf32> to vector<8x1xf32>
    %cst_11 = arith.constant 3.200000e+01 : f32
    %23 = vector.broadcast %cst_11 : f32 to vector<8x1xf32>
    %24 = arith.divf %22, %23 : vector<8x1xf32>
    %cst_12 = arith.constant 9.99999996E-13 : f32
    %25 = vector.broadcast %cst_12 : f32 to vector<8x1xf32>
    %26 = arith.addf %24, %25 : vector<8x1xf32>
    %27 = math.rsqrt %26 : vector<8x1xf32>
    %28 = vector.broadcast %27 : vector<8x1xf32> to vector<8x32xf32>
    %29 = arith.mulf %19, %28 : vector<8x32xf32>
    %c0_13 = arith.constant 0 : index
    %c0_14 = arith.constant 0 : index
    %30 = vector.load %arg4[%c0_13, %c0_14] : memref<1x32xf32, #tpu.memory_space<vmem>>, vector<1x32xf32>
    %31 = vector.broadcast %30 : vector<1x32xf32> to vector<8x32xf32>
    %32 = arith.mulf %29, %31 : vector<8x32xf32>
    %c0_15 = arith.constant 0 : index
    %c0_16 = arith.constant 0 : index
    %33 = vector.load %arg5[%c0_15, %c0_16] : memref<1x32xf32, #tpu.memory_space<vmem>>, vector<1x32xf32>
    %34 = vector.broadcast %33 : vector<1x32xf32> to vector<8x32xf32>
    %35 = arith.addf %32, %34 : vector<8x32xf32>
    %c0_17 = arith.constant 0 : index
    %c0_18 = arith.constant 0 : index
    %36 = vector.load %arg6[%c0_17, %c0_18] : memref<8x32xf32, #tpu.memory_space<vmem>>, vector<8x32xf32>
    tpu.vector_store %arg6[%c0_17, %c0_18], %35 {strides = array<i32>} : memref<8x32xf32, #tpu.memory_space<vmem>>, vector<8x32xf32>,
    return
  }
  func.func @transform_0(%arg0: i32) -> (i32, i32) {
    %c0_i32 = arith.constant 0 : i32
    %c0_i32_0 = arith.constant 0 : i32
    return %arg0, %c0_i32 : i32, i32
  }
  func.func @transform_1(%arg0: i32) -> (i32, i32) {
    %c0_i32 = arith.constant 0 : i32
    %c0_i32_0 = arith.constant 0 : i32
    %c0_i32_1 = arith.constant 0 : i32
    return %c0_i32, %c0_i32_0 : i32, i32
  }
  func.func @transform_2(%arg0: i32) -> (i32, i32) {
    %c0_i32 = arith.constant 0 : i32
    %c0_i32_0 = arith.constant 0 : i32
    %c0_i32_1 = arith.constant 0 : i32
    return %c0_i32, %c0_i32_0 : i32, i32
  }
  func.func @transform_3(%arg0: i32) -> (i32, i32) {
    %c0_i32 = arith.constant 0 : i32
    %c0_i32_0 = arith.constant 0 : i32
    %c0_i32_1 = arith.constant 0 : i32
    return %c0_i32, %c0_i32_0 : i32, i32
  }
  func.func @transform_4(%arg0: i32) -> (i32, i32) {
    %c0_i32 = arith.constant 0 : i32
    %c0_i32_0 = arith.constant 0 : i32
    %c0_i32_1 = arith.constant 0 : i32
    return %c0_i32, %c0_i32_0 : i32, i32
  }
  func.func @transform_5(%arg0: i32) -> (i32, i32) {
    %c0_i32 = arith.constant 0 : i32
    %c0_i32_0 = arith.constant 0 : i32
    return %arg0, %c0_i32 : i32, i32
  }
}

</mosaic_0001>

<bundles_post_ra>
// kernel: tpu_custom_call.1
= control target key start
LH: loop header
LB: loop body
LE: loop exit
PB: predicated region body
PF: predicated region fallthrough
CT: control target
= control target key end

     0   :  { %10 = vsyncpa [#allocation3], 0  ;;  %s958_s0 = inlined_call_operand.hbm [shape: f32[16,32], index: 0, kind: input, shape index: {}]   ;;  %s959_s1 = inlined_call_operand.hbm [shape: f32[32,32], index: 1, kind: input, shape index: {}]   ;;  %s960_s2 = inlined_call_operand.vmem [shape: f32[1,32], index: 2, kind: input, shape index: {}]   ;;  %s961_s3 = inlined_call_operand.vmem [shape: f32[1,32], index: 3, kind: input, shape index: {}]   ;;  %s962_s4 = inlined_call_operand.vmem [shape: f32[1,32], index: 4, kind: input, shape index: {}]   ;;  %s963_s5 = inlined_call_operand.hbm [shape: f32[16,32], index: 5, kind: output, shape index: {}]  }
   0x1   :  { %12 = vsyncpa [#allocation3 + $0x1], 0 }
   0x2   :  { %13 = vsyncpa [#allocation6], 0 }
   0x3   :  { %14 = vsyncpa [#allocation4], 0 }
   0x4   :  { %16 = vsyncpa [#allocation4 + $0x1], 0  ;;  %s745_s18 = smov 0   ;;  %s747_s19 = smov 0  }
   0x5   :  { %s749_s20 = smov 0   ;;  %s751_s21 = smov 0  }
   0x6 LB: > { %s766_s22 = sadd.s32 4294967295, %s705_s21   ;;  %s471_s23 = sadd.s32 4294967294, %s705_s21   ;;  %s705_s21 = sphi %s751_s21, %s983_s21   ;;  %s701_s20 = sphi %s749_s20, %s982_s20   ;;  %s697_s19 = sphi %s747_s19, %s981_s19   ;;  %s693_s18 = sphi %s745_s18, %s980_s18  }
   0x7   : > { %p42_p0 = scmp.ne.s32.totalorder %s697_s19, %s693_s18  ;;  %p964_p1 = scmp.eq.s32.totalorder %s766_s22, 0 }
   0x8   : > { %p156_p3 = scmp.eq.s32.totalorder %s471_s23, 1  ;;  %p472_p5 = scmp.ge.s32.totalorder %s705_s21, 1 }
   0x9   : > { %p775_p4 = por %p964_p1, %p42_p0  ;;  %p163_p7 = scmp.lt.s32.totalorder %s705_s21, 3 }
   0xa   : > { %p780_p6 = por %p156_p3, %p42_p0  ;;  %s707_s27 = smov [#allocation5]  }
   0xb   : > { %s967_s24 = scalar_select %p775_p4, 1, 0 }
   0xc   : > { %s968_s25 = scalar_select %p780_p6, 1, 0 }
   0xd   : > { %p785_p8 = pnand %p472_p5, %p163_p7  ;;  %s175_s28 = sshll.u32 %s707_s27, 4  ;;  %s789_s28 = int_to_ptr.vmem [resolvable:$true] %s175_s28 }
   0xe   : > { %s801_s30 = sadd.s32 1, %s705_s21   ;;  %s29_s6 = sadd.s32 1, %s701_s20 }
   0xf   : > { %s969_s26 = scalar_select %p785_p8, 1, 0 }
  0x10   : > { %p519_p9 = pneg %p785_p8  ;;  %s26_s7 = ssub.s32 %s705_s21, %s801_s30 }
  0x11   : > { %s577_s10 = scalar_lea.hbm %s959_s1, 512 }
  0x12   : > { %p796_p11 = pnand %p519_p9, %p964_p1  ;;  %p578_p12 = scmp.ne.s32.totalorder %s959_s1, %s577_s10 }
  0x13   : > { %p584_p5 = scmp.lt.u32.totalorder %s577_s10, %s959_s1 }
  0x14   : > { %p579_p13 = pneg %p796_p11 }
  0x16   : > { %p580_p0 = pnand %p579_p13, %p578_p12 }
  0x18   : > { %p581_p3 = pneg %p580_p0 }
  0x1a   : > { %p586_p7 = pnand %p584_p5, %p581_p3 }
  0x1c   : > { %589 = shalt.err (!%p586_p7)
}
  0x1d   : > { %s590_s15 = scalar_lea.vmem %s789_s28, 512  ;;  %p598_p2 = scmp.lt.s32.totalorder %s789_s28, %s789_s28 }
  0x1e   : > { %p591_p9 = scmp.ne.s32.totalorder %s789_s28, %s590_s15  ;;  %p599_p6 = scmp.lt.s32.totalorder %s590_s15, %s590_s15 }
  0x20   : > { %p593_p10 = pnand %p591_p9, %p579_p13  ;;  %p600_p4 = por %p599_p6, %p598_p2 }
  0x22   : > { %p594_p1 = pneg %p593_p10 }
  0x24   : > { %p601_p8 = pnand %p600_p4, %p594_p1 }
  0x26   : > { %604 = shalt.err (!%p601_p8)
}
  0x27   : > { %s708_s16 = smov 128   ;;  %s709_s17 = smov 8  }
  0x28   : > { %522 = dma.hbm_to_vmem [thread:$0]  (!%p796_p11), %s959_s1, 512, %s789_s28, [#allocation6], %s708_s16, %s708_s16, %s709_s17  }
  0x29   : > { %p27_p2 = scmp.eq.s32.totalorder %s26_s7, 0  ;;  %p36_p1 = scmp.ne.s32.totalorder %s701_s20, %s697_s19 }
  0x2a   : > { %p37_p4 = scmp.eq.s32.totalorder %s705_s21, 0  ;;  %p532_p6 = scmp.lt.s32.totalorder %s705_s21, 2 }
  0x2b   : > { %s832_s8 = scalar_select %p27_p2, %s701_s20, %s29_s6  }
  0x2c   : > { %p38_p8 = por %p37_p4, %p36_p1  ;;  %p971_p10 = scmp.eq.s32.totalorder %s766_s22, 1 }
  0x2d   : > { %s198_s10 = sand.u32 1, %s701_s20   ;;  %s476_s11 = sshll.u32 %s705_s21, 7 }
  0x2e   : > { %p836_p12 = por %p971_p10, %p36_p1  ;;  %s475_s12 = sshll.u32 %s198_s10, 3 }
  0x2f   : > { %s845_s14 = scalar_lea.hbm %s958_s0, %s476_s11  ;;  %s202_s28 = scalar_lea.vmem [#allocation2], %s475_s12 }
  0x30   : > { %s209_s6 = sshll.u32 %s202_s28, 4  ;;  %p847_p11 = pnand %p532_p6, %p38_p8  ;;  %s851_s6 = int_to_ptr.vmem [resolvable:$true] %s209_s6 }
  0x31   : > { %s199_s15 = scalar_lea.sflag [#allocation3], %s198_s10  ;;  %s605_s16 = scalar_lea.hbm %s845_s14, 128 }
  0x32   : > { %p606_p13 = scmp.ne.s32.totalorder %s845_s14, %s605_s16  ;;  %p607_p0 = pneg %p847_p11 }
  0x33   : > { %s610_s27 = scalar_lea.hbm %s958_s0, 256  ;;  %p611_p7 = scmp.lt.u32.totalorder %s845_s14, %s958_s0 }
  0x34   : > { %p608_p3 = pnand %p607_p0, %p606_p13  ;;  %p612_p9 = scmp.lt.u32.totalorder %s610_s27, %s605_s16 }
  0x35   : > { %p614_p1 = scmp.lt.u32.totalorder %s605_s16, %s845_s14 }
  0x36   : > { %p609_p5 = pneg %p608_p3  ;;  %p613_p2 = por %p612_p9, %p611_p7 }
  0x38   : > { %p615_p4 = por %p614_p1, %p613_p2 }
  0x3a   : > { %p616_p6 = pnand %p615_p4, %p609_p5 }
  0x3c   : > { %619 = shalt.err (!%p616_p6)
}
  0x3d   : > { %s620_s10 = scalar_lea.vmem %s851_s6, 128  ;;  %s710_s29 = smov [#allocation2]  }
  0x3e   : > { %p621_p8 = scmp.ne.s32.totalorder %s851_s6, %s620_s10  ;;  %s625_s13 = sshll.u32 %s710_s29, 4  ;;  %s626_s13 = int_to_ptr.vmem [resolvable:$false] %s625_s13 }
  0x3f   : > { %s627_s28 = scalar_lea.vmem %s626_s13, 256  ;;  %p628_p3 = scmp.lt.s32.totalorder %s851_s6, %s626_s13 }
  0x40   : > { %p623_p10 = pnand %p621_p8, %p607_p0  ;;  %p629_p7 = scmp.lt.s32.totalorder %s627_s28, %s620_s10 }
  0x42   : > { %p624_p13 = pneg %p623_p10  ;;  %p630_p9 = por %p629_p7, %p628_p3 }
  0x44   : > { %p631_p2 = pnand %p630_p9, %p624_p13 }
  0x46   : > { %634 = shalt.err (!%p631_p2)
}
  0x47   : > { %526 = dma.hbm_to_vmem [thread:$0]  (!%p847_p11), %s845_s14, 128, %s851_s6, %s199_s15  }
  0x48   : > { %p974_p5 = scmp.ne.s32.totalorder %s969_s26, 0 }
  0x49   : > { %s881_s16 = sand.u32 (!%p974_p5), 1, %s697_s19   ;;  %p975_p0 = scmp.ne.s32.totalorder (!%p974_p5), %s967_s24, 0 }
  0x4a   : > { %218 = sbr.rel (%p974_p5) target bundleno = 653 (0x28d), region = 40  ;;  %s478_s17 = sshll.u32 (!%p974_p5), %s881_s16, 3 }
  0x4b   : > { %s221_s23 = scalar_lea.sflag (!%p974_p5), [#allocation3], %s881_s16  ;;  %s224_s27 = scalar_lea.vmem (!%p974_p5), [#allocation2], %s478_s17 }
  0x51   : > { %680 = dma.done.wait (%p975_p0), %s221_s23, 128  }
  0x52   : > { %682 = vsyncadd (%p975_p0), %s221_s23, 4294967168  ;;  %p976_p11 = scmp.eq.s32.totalorder %s766_s22, 0 }
  0x54   : > { %684 = dma.done.wait (%p976_p11), [#allocation6], 512   ;;  %p977_p1 = pmov %p976_p11 }
  0x55   : > { %v711_v0 = vmov 0.0|0.0   ;;  %vm712_vm0 = vmmov 0   ;;  %v713_v1 = vmov 0.0   ;;  %v256_v2 = vld [vmem:[#allocation5] sm:$0xff]  ;;  %v257_v3 = vld [vmem:[#allocation5 + $0x8] sm:$0xff]  ;;  %v258_v4 = vld [vmem:[#allocation5 + $0x10] sm:$0xff] }
  0x56   : > { %686 = vsyncadd (%p977_p1), [#allocation6], 4294966784  ;;  %505 = vmatprep.subr.bf16.mxu0 %v711_v0  ;;  %502 = vmatprep.mubr.msk.f32.mxu0 %vm712_vm0, %v713_v1  ;;  %v506_v5 = vpack.c.bf16 %v257_v3, %v256_v2  ;;  %v259_v6 = vld [vmem:[#allocation5 + $0x18] sm:$0xff]  ;;  %vm267_vm1 = vcmask 261120   ;;  %v481_v9 = vld [vmem:[%s960_s2] ss:$0 sm:$0xff] }
  0x57   : > { %v509_v7 = vpack.c.bf16 %v259_v6, %v258_v4  ;;  %v255_v8 = vld [vmem:[%s224_s27] sm:$0xff]  ;;  %s486_s11 = sshll.u32 %s766_s22, 7  ;;  %s254_s12 = scalar_lea.vmem [#allocation7], %s478_s17 }
  0x58   : > { %507 = vmatpush3.bf16.msra.mxu0 %v506_v5  ;;  %v483_v28 = vld [vmem:[%s961_s3] ss:$0 sm:$0xff]  ;;  %s391_s10 = sshll.u32 %s254_s12, 4  ;;  %s913_s28 = scalar_lea.hbm %s963_s5, %s486_s11  ;;  %s915_s10 = int_to_ptr.vmem [resolvable:$true] %s391_s10 }
  0x59   : > { %508 = vmatprep.subr.bf16.mxu0 %v711_v0  ;;  %v484_v30 = vld [vmem:[%s962_s4] ss:$0 sm:$0xff]  ;;  %s378_s23 = scalar_lea.sflag [#allocation4], %s881_s16  ;;  %s635_s27 = scalar_lea.vmem %s915_s10, 128 }
  0x5a   : > { %p636_p4 = scmp.ne.s32.totalorder %s915_s10, %s635_s27  ;;  %s714_s22 = smov [#allocation7]  }
  0x5b   : > { %s639_s17 = sshll.u32 %s714_s22, 4  ;;  %s640_s17 = int_to_ptr.vmem [resolvable:$false] %s639_s17 }
  0x5c   : > { %510 = vmatpush3.bf16.msra.mxu0 %v509_v7  ;;  %p637_p6 = pnand %p636_p4, %p836_p12  ;;  %s641_s24 = scalar_lea.vmem %s640_s17, 256 }
  0x5d   : > { %p642_p10 = scmp.lt.s32.totalorder %s915_s10, %s640_s17  ;;  %p643_p13 = scmp.lt.s32.totalorder %s641_s24, %s635_s27 }
  0x5e   : > { %p638_p8 = pneg %p637_p6 }
  0x5f   : > { %503 = vmatmul.mubr.msk.f32.vlgmr.msra.gmra.mrb[0].mxu0 %vm267_vm1, %v255_v8  ;;  %p644_p3 = por %p643_p13, %p642_p10 }
  0x61   : > { %p645_p7 = pnand %p644_p3, %p638_p8 }
 0x132   : > { %v337_v10 = vpop.f32.mrb[0].mxu0 }
 0x133   : > { %v338_v11 = vadd.f32 %v481_v9, %v337_v10  ;;  %v504_v12 = vpop.f32.mrb[1].mxu0 }
 0x135   : > { %v342_v13 = vmul.f32 0.70710677, %v338_v11  ;;  %v341_v15 = vmul.f32 0.5, %v338_v11 }
 0x137   : > { %573 = verf.f32 %v342_v13 }
 0x141   : > { %v574_v14 = vpop.eup %573 }
 0x142   : > { %v344_v16 = vadd.f32 1.0, %v574_v14 }
 0x144   : > { %v345_v17 = vmul.f32 %v344_v16, %v341_v15 }
 0x146   : > { %v346_v18 = vsel %vm267_vm1, %v345_v17, 0.0 }
 0x147   : > { %347 = vadd.xlane.f32.xlu0 %v346_v18 }
 0x1d4   : > { %v348_v19 = vpop.xlane.xlu0 %347 }
 0x1d5   : > { %v350_v20 = vmul.f32 0.03125, %v348_v19 }
 0x1d7   : > { %v351_v21 = vsub.f32 %v345_v17, %v350_v20 }
 0x1d9   : > { %v352_v22 = vmul.f32 %v351_v21, %v351_v21 }
 0x1db   : > { %v353_v23 = vsel %vm267_vm1, %v352_v22, 0.0 }
 0x1dc   : > { %354 = vadd.xlane.f32.xlu0 %v353_v23 }
 0x269   : > { %v355_v24 = vpop.xlane.xlu0 %354 }
 0x26a   : > { %v356_v25 = vmul.f32 0.03125, %v355_v24 }
 0x26c   : > { %v357_v26 = vadd.f32 1e-12, %v356_v25 }
 0x26e   : > { %575 = vrsqrt.f32 %v357_v26 }
 0x278   : > { %v576_v27 = vpop.eup %575 }
 0x279   : > { %v359_v29 = vmul.f32 %v576_v27, %v351_v21 }
 0x27b   : > { %v367_v31 = vmul.f32 %v483_v28, %v359_v29 }
 0x27d   : > { %v375_v32 = vadd.f32 %v484_v30, %v367_v31 }
 0x27f   : > { %376 = vst.msk [vmem:[%s254_s12] sm:$0xff] %vm267_vm1, %v375_v32 }
 0x280   : > { %648 = shalt.err (!%p645_p7)
}
 0x281   : > { %s649_s16 = scalar_lea.hbm %s913_s28, 128  ;;  %s653_s6 = scalar_lea.hbm %s963_s5, 256 }
 0x282   : > { %p650_p9 = scmp.ne.s32.totalorder %s913_s28, %s649_s16  ;;  %p654_p0 = scmp.lt.u32.totalorder %s913_s28, %s963_s5 }
 0x283   : > { %p655_p11 = scmp.lt.u32.totalorder %s653_s6, %s649_s16  ;;  %p657_p4 = scmp.lt.u32.totalorder %s649_s16, %s913_s28 }
 0x284   : > { %p651_p2 = pnand %p650_p9, %p836_p12 }
 0x285   : > { %p656_p1 = por %p655_p11, %p654_p0 }
 0x286   : > { %p652_p5 = pneg %p651_p2 }
 0x287   : > { %p658_p6 = por %p657_p4, %p656_p1 }
 0x289   : > { %p659_p8 = pnand %p658_p6, %p652_p5 }
 0x28b   : > { %662 = shalt.err (!%p659_p8)
}
 0x28c   : > { %517 = dma.vmem_to_hbm [thread:$0]  (%p836_p12), %s915_s10, 128, %s913_s28, %s378_s23  }
 0x28d PF: > { %s403_s11 = sand.u32 1, %s693_s18   ;;  %p978_p10 = scmp.ne.s32.totalorder %s968_s25, 0 }
 0x28e   : > { %p979_p13 = scmp.ge.s32.totalorder %s705_s21, 2  ;;  %s404_s12 = scalar_lea.sflag [#allocation4], %s403_s11 }
 0x290   : > { %p528_p3 = pnand %p979_p13, %p978_p10 }
 0x292   : > { %688 = dma.done.wait (!%p528_p3), %s404_s12, 128  }
 0x293   : > { %690 = vsyncadd (!%p528_p3), %s404_s12, 4294967168  ;;  %p19_p7 = scmp.ge.s32.totalorder %s801_s30, 4   ;;  %s980_s18 = smov %s697_s19 }
 0x294   : > { %s981_s19 = smov %s701_s20  ;;  %s982_s20 = smov %s832_s8 }
 0x295   : > { %s983_s21 = smov %s801_s30  ;;  %21 = sbr.rel (!%p19_p7) target bundleno = 6 (0x6), region = 89 }
 0x29c   :  { %409 = vsyncpa [#allocation3], 1 }
 0x29d   :  { %411 = vsyncpa [#allocation3 + $0x1], 1 }
 0x29e   :  { %412 = vsyncpa [#allocation6], 1 }
 0x29f   :  { %413 = vsyncpa [#allocation4], 1 }
 0x2a0   :  { %415 = vsyncpa [#allocation4 + $0x1], 1 }

</bundles_post_ra>
